<compile_context>
chip_gen: v7x
topology: tpu7x:2x2x1
jax: 0.10.0
libtpu: 0.0.40
codegen_flags: <defaults>
</compile_context>

<pallas_src>
import math
import jax
import jax.numpy as jnp
from jax.experimental import pallas as pl
from jax.experimental.pallas import tpu as pltpu

# ----------------------------- config (small, module-consistent) -------------
S = 8          # sequence length
B = 2          # batch
D = 32         # emb_size (even, as required by the sin/cos interleave)
MAXLEN = 64    # positional table length (module default is 5000; kept small here)


# ----------------------------- host-side buffer (matches module __init__) ----
def make_pos_embedding(emb_size: int, maxlen: int) -> jnp.ndarray:
    """Sinusoidal table identical to the PyTorch registered buffer: (maxlen, 1, emb_size)."""
    den = jnp.exp(-jnp.arange(0, emb_size, 2, dtype=jnp.float32)
                  * (math.log(10000.0) / emb_size))
    pos = jnp.arange(0, maxlen, dtype=jnp.float32).reshape(maxlen, 1)
    pe = jnp.zeros((maxlen, emb_size), dtype=jnp.float32)
    pe = pe.at[:, 0::2].set(jnp.sin(pos * den))
    pe = pe.at[:, 1::2].set(jnp.cos(pos * den))
    return pe.reshape(maxlen, 1, emb_size)          # unsqueeze(-2)


# ----------------------------- Pallas kernel ---------------------------------
def pos_encoding_kernel(x_ref, pe_ref, o_ref):
    # x_ref : (B, S*D)  token embeddings, batch-major lane-dense slab (256 lanes)
    # pe_ref: (1, S*D)  positional encodings, broadcast over the B sublanes
    o_ref[...] = x_ref[...] + pe_ref[...]
    # TODO(synk): train-mode dropout (stochastic masking via pltpu.prng_*) is not
    #             implemented; eval-mode dropout is the identity.


# ----------------------------- wrapper ----------------------------------------
def positional_encoding_forward(token_embedding, pos_embedding):
    """token_embedding: (S, B, D) float32 (PyTorch layout). Returns (S, B, D)."""
    s, b, d = token_embedding.shape
    pe = pos_embedding[:s, 0, :]                                    # (S, D)

    # Layout plumbing on the host (free one-time XLA ops): lane-dense (B, S*D) slab.
    x_flat = jnp.transpose(token_embedding, (1, 0, 2)).reshape(b, s * d)
    pe_flat = pe.reshape(1, s * d)

    out_flat = pl.pallas_call(
        pos_encoding_kernel,
        out_shape=jax.ShapeDtypeStruct((b, s * d), jnp.float32),
        in_specs=[
            pl.BlockSpec(memory_space=pltpu.MemorySpace.VMEM),      # whole x slab
            pl.BlockSpec(memory_space=pltpu.MemorySpace.VMEM),      # whole pe row
        ],
        out_specs=pl.BlockSpec(memory_space=pltpu.MemorySpace.VMEM),
    )(x_flat, pe_flat)

    return jnp.transpose(out_flat.reshape(b, s, d), (1, 0, 2))      # back to (S, B, D)


# ----------------------------- pure-JAX reference ------------------------------
def reference_forward(token_embedding, pos_embedding):
    s = token_embedding.shape[0]
    return token_embedding + pos_embedding[:s, :]                   # broadcast over batch


# ----------------------------- main -------------------------------------------
if __name__ == "__main__":
    key = jax.random.PRNGKey(0)
    token_embedding = jax.random.normal(key, (S, B, D), dtype=jnp.float32)
    pos_embedding = make_pos_embedding(D, MAXLEN)

    out = positional_encoding_forward(token_embedding, pos_embedding)
    out = jax.block_until_ready(out)

    ref = reference_forward(token_embedding, pos_embedding)
    assert out.shape == (S, B, D)
    assert jnp.allclose(out, ref, atol=1e-6, rtol=1e-6), "mismatch vs JAX reference"

    print("KERNEL_OK")
</pallas_src>

<mosaic_0001>
module attributes {stable_mosaic.version = 11 : i64} {
  func.func @pos_encoding_kernel(%arg0: memref<2x256xf32, #tpu.memory_space<vmem>>, %arg1: memref<1x256xf32, #tpu.memory_space<vmem>>, %arg2: memref<2x256xf32, #tpu.memory_space<vmem>>) attributes {dimension_semantics = [], scalar_prefetch = 0 : i64, scratch_operands = 0 : i64, tpu.core_type = #tpu.core_type<tc>} {
    %c0 = arith.constant 0 : index
    %c0_0 = arith.constant 0 : index
    %0 = vector.load %arg0[%c0, %c0_0] : memref<2x256xf32, #tpu.memory_space<vmem>>, vector<2x256xf32>
    %c0_1 = arith.constant 0 : index
    %c0_2 = arith.constant 0 : index
    %1 = vector.load %arg1[%c0_1, %c0_2] : memref<1x256xf32, #tpu.memory_space<vmem>>, vector<1x256xf32>
    %2 = vector.broadcast %1 : vector<1x256xf32> to vector<2x256xf32>
    %3 = arith.addf %0, %2 : vector<2x256xf32>
    %c0_3 = arith.constant 0 : index
    %c0_4 = arith.constant 0 : index
    %4 = vector.load %arg2[%c0_3, %c0_4] : memref<2x256xf32, #tpu.memory_space<vmem>>, vector<2x256xf32>
    tpu.vector_store %arg2[%c0_3, %c0_4], %3 {strides = array<i32>} : memref<2x256xf32, #tpu.memory_space<vmem>>, vector<2x256xf32>,
    return
  }
}

</mosaic_0001>

<bundles_post_ra>
// kernel: tpu_custom_call.1
= control target key start
LH: loop header
LB: loop body
LE: loop exit
PB: predicated region body
PF: predicated region fallthrough
CT: control target
= control target key end

     0   :  { %7 = vsyncpa [#allocation3], 0  ;;  %s157_s0 = inlined_call_operand.hbm [shape: f32[2,256], index: 0, kind: input, shape index: {}]   ;;  %s158_s1 = inlined_call_operand.vmem [shape: f32[1,256], index: 1, kind: input, shape index: {}]   ;;  %s159_s2 = inlined_call_operand.hbm [shape: f32[2,256], index: 2, kind: output, shape index: {}]  }
   0x1   :  { %8 = vsyncpa [#allocation4], 0  ;;  %s112_s9 = smov [#allocation2]   ;;  %s64_s13 = scalar_lea.hbm %s157_s0, 64 }
   0x2   :  { %s15_s10 = sshll.u32 %s112_s9, 4  ;;  %p65_p0 = scmp.ne.s32.totalorder %s157_s0, %s64_s13  ;;  %s16_s10 = int_to_ptr.vmem [resolvable:$true] %s15_s10 }
   0x3   :  { %p68_p1 = scmp.lt.u32.totalorder %s64_s13, %s157_s0 }
   0x5   :  { %p70_p2 = pnand %p68_p1, %p65_p0 }
   0x7   :  { %73 = shalt.err (!%p70_p2)
}
   0x8   :  { %s74_s18 = scalar_lea.vmem %s16_s10, 64  ;;  %p79_p4 = scmp.lt.s32.totalorder %s16_s10, %s16_s10 }
   0x9   :  { %p75_p3 = scmp.ne.s32.totalorder %s16_s10, %s74_s18  ;;  %p80_p5 = scmp.lt.s32.totalorder %s74_s18, %s74_s18 }
   0xb   :  { %p81_p6 = por %p80_p5, %p79_p4 }
   0xd   :  { %p82_p7 = pnand %p81_p6, %p75_p3 }
   0xf   :  { %85 = shalt.err (!%p82_p7)
}
  0x10   :  { %18 = dma.hbm_to_vmem [thread:$0]  %s157_s0, 64, %s16_s10, [#allocation3]  }
  0x11   :  { %108 = dma.done.wait [#allocation3], 64  }
  0x12   :  { %109 = vsyncadd [#allocation3], 4294967232  ;;  %v27_v0 = vlaneseq  ;;  %v113_v1 = vmov 1983009808   ;;  %v25_v7 = vld [vmem:[%s158_s1] sm:$0x3] }
  0x13   :  { %v37_v2 = vunpack.c.l.s4 %v113_v1  ;;  %v24_v12 = vld [vmem:[#allocation2] sm:$0xf]  ;;  %s114_s23 = smov [#allocation5]  }
  0x14   :  { %v28_v3 = vshrl.u32 %v27_v0, 7  ;;  %s52_s0 = sshll.u32 %s114_s23, 4  ;;  %s53_s0 = int_to_ptr.vmem [resolvable:$true] %s52_s0 }
  0x15   :  { %v38_v6 = vunpack.c.0.s8 %v37_v2  ;;  %s86_s24 = scalar_lea.vmem %s53_s0, 64  ;;  %p91_p9 = scmp.lt.s32.totalorder %s53_s0, %s53_s0 }
  0x16   :  { %v29_v4 = vsub.s32 0, %v28_v3  ;;  %v33_v5 = vsub.s32 1, %v28_v3  ;;  %p87_p8 = scmp.ne.s32.totalorder %s53_s0, %s86_s24  ;;  %p92_p10 = scmp.lt.s32.totalorder %s86_s24, %s86_s24 }
  0x17   :  { %v41_v10 = vsub.s32 %v38_v6, %v28_v3 }
  0x18   :  { %v30_v8 = vrot.slane %v25_v7, %v29_v4  ;;  %v34_v9 = vrot.slane %v25_v7, %v33_v5  ;;  %p93_p11 = por %p92_p10, %p91_p9 }
  0x1a   :  { %v35_v11 = vcombine.low %v30_v8, %v34_v9  ;;  %p94_p12 = pnand %p93_p11, %p87_p8 }
  0x1c   :  { %v42_v13 = vrot.slane %v35_v11, %v41_v10 }
  0x1e   :  { %v44_v14 = vadd.f32 %v42_v13, %v24_v12 }
  0x20   :  { %45 = vst [vmem:[#allocation5] sm:$0xf] %v44_v14 }
  0x21   :  { %97 = shalt.err (!%p94_p12)
}
  0x22   :  { %s98_s26 = scalar_lea.hbm %s159_s2, 64 }
  0x23   :  { %p99_p13 = scmp.ne.s32.totalorder %s159_s2, %s98_s26  ;;  %p102_p0 = scmp.lt.u32.totalorder %s98_s26, %s159_s2 }
  0x25   :  { %p104_p1 = pnand %p102_p0, %p99_p13 }
  0x27   :  { %107 = shalt.err (!%p104_p1)
}
  0x28   :  { %55 = dma.vmem_to_hbm [thread:$0]  %s53_s0, 64, %s159_s2, [#allocation4]  }
  0x29   :  { %110 = dma.done.wait [#allocation4], 64  }
  0x2a   :  { %111 = vsyncadd [#allocation4], 4294967232 }
  0x2b   :  { %59 = vsyncpa [#allocation3], 1 }
  0x2c   :  { %60 = vsyncpa [#allocation4], 1 }

</bundles_post_ra>
